<compile_context>
chip_gen: v5e
topology: v5e:2x2
jax: 0.10.0
libtpu: 0.0.40
codegen_flags: <defaults>
</compile_context>

<pallas_src>
import functools
import math

import jax
import jax.numpy as jnp
from jax.experimental import pallas as pl
from jax.experimental.pallas import tpu as pltpu

FEAT = 4              # in_features == out_features == 4
PACK = 32             # logical rows packed per 128-lane group
LANES = PACK * FEAT   # 128


def _linear_relu_linear_kernel(x_ref, w_ref, b_ref, o_ref, *, mxu_dtype):
    # x_ref: (TILE, 128) packed rows; w_ref: (128, 128) block-diag w^T;
    # b_ref: (1, 128) tiled bias.
    x = x_ref[...]
    w = w_ref[...]
    b = b_ref[...]

    if mxu_dtype is not None:
        xm = x.astype(mxu_dtype)
        wm = w.astype(mxu_dtype)
    else:
        xm, wm = x, w

    h = jnp.dot(xm, wm, preferred_element_type=jnp.float32) + b
    h = jnp.maximum(h, 0.0)                              # F.relu (f32 on VPU)
    hm = h.astype(mxu_dtype) if mxu_dtype is not None else h
    y = jnp.dot(hm, wm, preferred_element_type=jnp.float32) + b
    o_ref[...] = y.astype(o_ref.dtype)


def _forward_packed(x_packed, w_bd, b_tiled, *, tile_p, mxu_dtype):
    """Run the kernel on already-packed (P, 128) activations -> (P, 128)."""
    p = x_packed.shape[0]

    # Tile sizing: big tiles to amortize per-step overhead, but capped at
    # ceil(P/2) (8-sublane aligned) so there are >=2 grid steps when possible
    # (keeps v7x's second TensorCore busy via the "parallel" axis).
    half = -(-p // 2)
    half = max(8, ((half + 7) // 8) * 8)
    tile = max(8, min(tile_p, half))
    tile = ((tile + 7) // 8) * 8

    p_pad = -(-p // tile) * tile
    if p_pad != p:
        x_packed = jnp.zeros((p_pad, LANES), x_packed.dtype).at[:p].set(x_packed)

    grid = (p_pad // tile,)

    # Explicit VMEM budget: 2 buffers x (x tile + out tile) + resident weight
    # and bias + headroom.  Keeps larger tiles portable to v7x (64 MiB VMEM).
    tile_bytes = tile * LANES * 4
    vmem_bytes = 4 * tile_bytes + 2 * LANES * LANES * 4 + 2 * LANES * 4 + (2 << 20)
    vmem_bytes = min(max(vmem_bytes, 32 << 20), 64 << 20)

    out_packed = pl.pallas_call(
        functools.partial(_linear_relu_linear_kernel, mxu_dtype=mxu_dtype),
        out_shape=jax.ShapeDtypeStruct((p_pad, LANES), x_packed.dtype),
        grid_spec=pltpu.PrefetchScalarGridSpec(
            num_scalar_prefetch=0,
            grid=grid,
            in_specs=[
                pl.BlockSpec((tile, LANES), lambda i: (i, 0)),    # x streams
                pl.BlockSpec((LANES, LANES), lambda i: (0, 0)),   # weight resident
                pl.BlockSpec((1, LANES), lambda i: (0, 0)),       # bias resident
            ],
            out_specs=pl.BlockSpec((tile, LANES), lambda i: (i, 0)),
        ),
        compiler_params=pltpu.CompilerParams(
            dimension_semantics=("parallel",),   # shard batch across v7x's 2 TCs
            vmem_limit_bytes=int(vmem_bytes),
        ),
    )(x_packed, w_bd, b_tiled)

    return out_packed[:p]


def make_linear_relu_linear(w, b, *, tile_p=4096, use_bf16_mxu=False,
                            small_n_threshold=8192):
    """Factory: hoists w_bd / b_tiled construction out of the per-call path.

    Returns (forward, forward_packed):
      forward(x)         : x (N, 4) -> (N, 4)
      forward_packed(xp) : xp (P, 128) packed layout -> (P, 128) packed layout
                           (no pack/unpack HBM passes; use when adjacent ops
                           can also consume/produce the packed layout).
    """
    w = jnp.asarray(w, jnp.float32)
    b = jnp.asarray(b, jnp.float32)
    assert w.shape == (FEAT, FEAT) and b.shape == (FEAT,)

    # Built once per parameter set (perf feedback: not per forward call).
    w_bd = jnp.kron(jnp.eye(PACK, dtype=w.dtype), w.T)        # (128, 128)
    b_tiled = jnp.tile(b, PACK).reshape(1, LANES)             # (1, 128)
    w_t = w.T
    mxu_dtype = jnp.bfloat16 if use_bf16_mxu else None

    def forward_packed(x_packed):
        return _forward_packed(x_packed, w_bd, b_tiled,
                               tile_p=tile_p, mxu_dtype=mxu_dtype)

    def forward(x):
        n, feat = x.shape
        assert feat == FEAT
        if n < small_n_threshold:
            # Small-N fast path: a single fused XLA pass over the (N, 4)
            # array beats pack -> pallas_call -> unpack for tiny batches.
            return jnp.maximum(x @ w_t + b, 0.0) @ w_t + b
        p = -(-n // PACK)
        n_pack = p * PACK
        if n_pack != n:
            x = jnp.zeros((n_pack, FEAT), x.dtype).at[:n].set(x)
        x_packed = x.reshape(p, LANES)
        out_packed = forward_packed(x_packed)
        # Padded rows only hold relu(b)@w^T+b garbage in their own 4-lane
        # groups (block-diagonal weight keeps groups independent); dropped here.
        return out_packed.reshape(n_pack, FEAT)[:n]

    return forward, forward_packed


def _kaiming_uniform_like_torch(key, shape, a=math.sqrt(5)):
    # torch.nn.init.kaiming_uniform_(w, a=sqrt(5)) on an (out, in) tensor.
    fan_in = shape[1]
    gain = math.sqrt(2.0 / (1.0 + a * a))
    bound = gain * math.sqrt(3.0 / fan_in)
    return jax.random.uniform(key, shape, dtype=jnp.float32,
                              minval=-bound, maxval=bound)


if __name__ == "__main__":
    key = jax.random.PRNGKey(0)
    kw, kx = jax.random.split(key)

    # Parameters (deterministic, matching the module's __init__ shapes).
    w = _kaiming_uniform_like_torch(kw, (FEAT, FEAT))   # nn.Parameter (4, 4)
    b = jnp.zeros((FEAT,), dtype=jnp.float32)           # nn.Parameter zeros(4)

    # --- small example batch, forced through the Pallas path --------------
    fwd_pallas, _ = make_linear_relu_linear(w, b, small_n_threshold=0)
    x = jax.random.normal(kx, (2, FEAT), dtype=jnp.float32)
    out = fwd_pallas(x)
    jax.block_until_ready(out)
    ref = jnp.maximum(x @ w.T + b, 0.0) @ w.T + b
    assert out.shape == (2, FEAT)
    assert jnp.allclose(out, ref, atol=1e-5, rtol=1e-5)

    # --- larger, non-multiple-of-32 batch: multi-step grid (2 steps) ------
    x_big = jax.random.normal(jax.random.fold_in(kx, 1), (1000, FEAT),
                              dtype=jnp.float32)
    fwd_small_tile, _ = make_linear_relu_linear(w, b, tile_p=16,
                                                small_n_threshold=0)
    out_big = fwd_small_tile(x_big)
    jax.block_until_ready(out_big)
    ref_big = jnp.maximum(x_big @ w.T + b, 0.0) @ w.T + b
    assert out_big.shape == (1000, FEAT)
    assert jnp.allclose(out_big, ref_big, atol=1e-5, rtol=1e-5)

    # --- small-N fast path (no Pallas) matches exactly --------------------
    fwd_fast, _ = make_linear_relu_linear(w, b)   # default threshold
    out_fast = fwd_fast(x)
    assert jnp.allclose(out_fast, ref, atol=1e-6, rtol=1e-6)

    # --- optional bf16-MXU variant (v5e / v7x fast path), looser tolerance
    fwd_bf16, _ = make_linear_relu_linear(w, b, use_bf16_mxu=True,
                                          small_n_threshold=0)
    out_bf16 = fwd_bf16(x_big)
    jax.block_until_ready(out_bf16)
    assert jnp.allclose(out_bf16, ref_big, atol=5e-2, rtol=5e-2)

    print("KERNEL_OK")
</pallas_src>

<mosaic_0001>
module attributes {stable_mosaic.version = 11 : i64} {
  func.func @_linear_relu_linear_kernel(%arg0: i32, %arg1: memref<8x128xf32, #tpu.memory_space<vmem>>, %arg2: memref<128x128xf32, #tpu.memory_space<vmem>>, %arg3: memref<1x128xf32, #tpu.memory_space<vmem>>, %arg4: memref<8x128xf32, #tpu.memory_space<vmem>>) attributes {dimension_semantics = [#tpu.dimension_semantics<parallel>], iteration_bounds = array<i64: 1>, scalar_prefetch = 0 : i64, scratch_operands = 0 : i64, tpu.core_type = #tpu.core_type<tc>, window_params = [{transform_indices = @transform_0, window_bounds = array<i64: 8, 128>}, {pipeline_mode = #tpu.pipeline_mode<synchronous>, transform_indices = @transform_1, window_bounds = array<i64: 128, 128>}, {pipeline_mode = #tpu.pipeline_mode<synchronous>, transform_indices = @transform_2, window_bounds = array<i64: 1, 128>}, {transform_indices = @transform_3, window_bounds = array<i64: 8, 128>}]} {
    %c0 = arith.constant 0 : index
    %c0_0 = arith.constant 0 : index
    %0 = vector.load %arg1[%c0, %c0_0] : memref<8x128xf32, #tpu.memory_space<vmem>>, vector<8x128xf32>
    %c0_1 = arith.constant 0 : index
    %c0_2 = arith.constant 0 : index
    %1 = vector.load %arg2[%c0_1, %c0_2] : memref<128x128xf32, #tpu.memory_space<vmem>>, vector<128x128xf32>
    %c0_3 = arith.constant 0 : index
    %c0_4 = arith.constant 0 : index
    %2 = vector.load %arg3[%c0_3, %c0_4] : memref<1x128xf32, #tpu.memory_space<vmem>>, vector<1x128xf32>
    %cst = arith.constant dense<0.000000e+00> : vector<8x128xf32>
    %3 = tpu.matmul %0, %1, %cst {dimension_numbers = #tpu.dot_dimension_numbers<[1], [0], [0], [1], [0, 0, 1, 1], [], []>} : vector<8x128xf32>, vector<128x128xf32>, vector<8x128xf32> -> vector<8x128xf32>
    %4 = vector.broadcast %2 : vector<1x128xf32> to vector<8x128xf32>
    %5 = arith.addf %3, %4 : vector<8x128xf32>
    %cst_5 = arith.constant 0.000000e+00 : f32
    %6 = vector.broadcast %cst_5 : f32 to vector<8x128xf32>
    %7 = arith.maximumf %5, %6 : vector<8x128xf32>
    %cst_6 = arith.constant dense<0.000000e+00> : vector<8x128xf32>
    %8 = tpu.matmul %7, %1, %cst_6 {dimension_numbers = #tpu.dot_dimension_numbers<[1], [0], [0], [1], [0, 0, 1, 1], [], []>} : vector<8x128xf32>, vector<128x128xf32>, vector<8x128xf32> -> vector<8x128xf32>
    %9 = vector.broadcast %2 : vector<1x128xf32> to vector<8x128xf32>
    %10 = arith.addf %8, %9 : vector<8x128xf32>
    %c0_7 = arith.constant 0 : index
    %c0_8 = arith.constant 0 : index
    %11 = vector.load %arg4[%c0_7, %c0_8] : memref<8x128xf32, #tpu.memory_space<vmem>>, vector<8x128xf32>
    tpu.vector_store %arg4[%c0_7, %c0_8], %10 {strides = array<i32>} : memref<8x128xf32, #tpu.memory_space<vmem>>, vector<8x128xf32>,
    return
  }
  func.func @transform_0(%arg0: i32) -> (i32, i32) {
    %c0_i32 = arith.constant 0 : i32
    %c0_i32_0 = arith.constant 0 : i32
    return %arg0, %c0_i32 : i32, i32
  }
  func.func @transform_1(%arg0: i32) -> (i32, i32) {
    %c0_i32 = arith.constant 0 : i32
    %c0_i32_0 = arith.constant 0 : i32
    %c0_i32_1 = arith.constant 0 : i32
    return %c0_i32, %c0_i32_0 : i32, i32
  }
  func.func @transform_2(%arg0: i32) -> (i32, i32) {
    %c0_i32 = arith.constant 0 : i32
    %c0_i32_0 = arith.constant 0 : i32
    %c0_i32_1 = arith.constant 0 : i32
    return %c0_i32, %c0_i32_0 : i32, i32
  }
  func.func @transform_3(%arg0: i32) -> (i32, i32) {
    %c0_i32 = arith.constant 0 : i32
    %c0_i32_0 = arith.constant 0 : i32
    return %arg0, %c0_i32 : i32, i32
  }
}

</mosaic_0001>

<bundles_post_ra>
// kernel: tpu_custom_call.1
= control target key start
LH: loop header
LB: loop body
LE: loop exit
PB: predicated region body
PF: predicated region fallthrough
CT: control target
= control target key end

     0   :  { %8 = vsyncpa [#allocation3], 0  ;;  %s247_s0 = inlined_call_operand.hbm [shape: f32[8,128], index: 0, kind: input, shape index: {}]   ;;  %s248_s1 = inlined_call_operand.hbm [shape: f32[128,128], index: 1, kind: input, shape index: {}]   ;;  %s249_s2 = inlined_call_operand.vmem [shape: f32[1,128], index: 2, kind: input, shape index: {}]   ;;  %s250_s3 = inlined_call_operand.hbm [shape: f32[8,128], index: 3, kind: output, shape index: {}]  }
   0x1   :  { %9 = vsyncpa [#allocation6], 0 }
   0x2   :  { %10 = vsyncpa [#allocation4], 0  ;;  %s16_s14 = sshll.u32 %s247_s0, 4  ;;  %s210_s15 = smov [#allocation2]   ;;  %s17_s14 = int_to_ptr.hbm [resolvable:$true] %s16_s14 }
   0x3   :  { %s18_s16 = sshll.u32 %s210_s15, 4  ;;  %s26_s19 = sshll.u32 %s248_s1, 4  ;;  %s19_s16 = int_to_ptr.vmem [resolvable:$true] %s18_s16  ;;  %s27_s19 = int_to_ptr.hbm [resolvable:$true] %s26_s19 }
   0x4   :  { %21 = dma.hbm_to_vmem [thread:$0]  %s17_s14, 128, %s19_s16, [#allocation3]  }
   0x5   :  { %s211_s20 = smov [#allocation5]   ;;  %s212_s22 = smov 128  }
   0x6   :  { %s28_s21 = sshll.u32 %s211_s20, 4  ;;  %s213_s23 = smov 8   ;;  %s29_s21 = int_to_ptr.vmem [resolvable:$true] %s28_s21 }
   0x7   :  { %34 = dma.hbm_to_vmem [thread:$0]  %s27_s19, 2048, %s29_s21, [#allocation6], %s212_s22, %s212_s22, %s213_s23  }
   0x8   :  { %204 = dma.done.wait [#allocation3], 128  }
   0x9   :  { %205 = vsyncadd [#allocation3], 4294967168 }
   0xa   :  { %206 = dma.done.wait [#allocation6], 2048  }
   0xb   :  { %207 = vsyncadd [#allocation6], 4294965248  ;;  %v61_v0 = vld [vmem:[#allocation5 + $0x78] sm:$0xff]  ;;  %v60_v1 = vld [vmem:[#allocation5 + $0x70] sm:$0xff]  ;;  %s214_s24 = smov [#allocation7]   ;;  %s115_s28 = sshll.u32 %s250_s3, 4  ;;  %s116_s28 = int_to_ptr.hbm [resolvable:$true] %s115_s28 }
   0xc   :  { %66 = vmatpush.msra.mxu0 %v61_v0  ;;  %87 = vmatpush.msra.mxu1 %v61_v0  ;;  %v59_v2 = vld [vmem:[#allocation5 + $0x68] sm:$0xff]  ;;  %v58_v3 = vld [vmem:[#allocation5 + $0x60] sm:$0xff]  ;;  %v57_v4 = vld [vmem:[#allocation5 + $0x58] sm:$0xff]  ;;  %s113_s25 = sshll.u32 %s214_s24, 4  ;;  %s114_s25 = int_to_ptr.vmem [resolvable:$true] %s113_s25 }
   0xd   :  { %v56_v5 = vld [vmem:[#allocation5 + $0x50] sm:$0xff]  ;;  %v55_v6 = vld [vmem:[#allocation5 + $0x48] sm:$0xff]  ;;  %v54_v7 = vld [vmem:[#allocation5 + $0x40] sm:$0xff] }
   0xe   :  { %67 = vmatpush.msra.mxu0 %v60_v1  ;;  %88 = vmatpush.msra.mxu1 %v60_v1  ;;  %v53_v8 = vld [vmem:[#allocation5 + $0x38] sm:$0xff]  ;;  %v52_v9 = vld [vmem:[#allocation5 + $0x30] sm:$0xff]  ;;  %v51_v10 = vld [vmem:[#allocation5 + $0x28] sm:$0xff] }
   0xf   :  { %v50_v11 = vld [vmem:[#allocation5 + $0x20] sm:$0xff]  ;;  %v49_v12 = vld [vmem:[#allocation5 + $0x18] sm:$0xff]  ;;  %v48_v13 = vld [vmem:[#allocation5 + $0x10] sm:$0xff] }
  0x10   :  { %68 = vmatpush.msra.mxu0 %v59_v2  ;;  %89 = vmatpush.msra.mxu1 %v59_v2  ;;  %v47_v14 = vld [vmem:[#allocation5 + $0x8] sm:$0xff]  ;;  %v46_v15 = vld [vmem:[#allocation5] sm:$0xff]  ;;  %v45_v16 = vld [vmem:[#allocation2] sm:$0xff] }
  0x11   :  { %v131_v17 = vld [vmem:[%s249_s2] ss:$0 sm:$0xff] }
  0x12   :  { %69 = vmatpush.msra.mxu0 %v58_v3  ;;  %90 = vmatpush.msra.mxu1 %v58_v3 }
  0x14   :  { %70 = vmatpush.msra.mxu0 %v57_v4  ;;  %91 = vmatpush.msra.mxu1 %v57_v4 }
  0x16   :  { %71 = vmatpush.msra.mxu0 %v56_v5  ;;  %92 = vmatpush.msra.mxu1 %v56_v5 }
  0x18   :  { %72 = vmatpush.msra.mxu0 %v55_v6  ;;  %93 = vmatpush.msra.mxu1 %v55_v6 }
  0x1a   :  { %73 = vmatpush.msra.mxu0 %v54_v7  ;;  %94 = vmatpush.msra.mxu1 %v54_v7 }
  0x1c   :  { %74 = vmatpush.msra.mxu0 %v53_v8  ;;  %95 = vmatpush.msra.mxu1 %v53_v8 }
  0x1e   :  { %75 = vmatpush.msra.mxu0 %v52_v9  ;;  %96 = vmatpush.msra.mxu1 %v52_v9 }
  0x20   :  { %76 = vmatpush.msra.mxu0 %v51_v10  ;;  %97 = vmatpush.msra.mxu1 %v51_v10 }
  0x22   :  { %77 = vmatpush.msra.mxu0 %v50_v11  ;;  %98 = vmatpush.msra.mxu1 %v50_v11 }
  0x24   :  { %78 = vmatpush.msra.mxu0 %v49_v12  ;;  %99 = vmatpush.msra.mxu1 %v49_v12 }
  0x26   :  { %79 = vmatpush.msra.mxu0 %v48_v13  ;;  %100 = vmatpush.msra.mxu1 %v48_v13 }
  0x28   :  { %80 = vmatpush.msra.mxu0 %v47_v14  ;;  %101 = vmatpush.msra.mxu1 %v47_v14 }
  0x2a   :  { %81 = vmatpush.msra.mxu0 %v46_v15  ;;  %102 = vmatpush.msra.mxu1 %v46_v15 }
  0x2b   :  { %82 = vmatmul.f32.vlgmr.msra.gmra.mxu0 %v45_v16 }
  0xa8   :  { %v83_v18 = vpop.f32.mrf.mxu0 }
  0xa9   :  { %v84_v19 = vadd.f32 %v131_v17, %v83_v18 }
  0xab   :  { %v86_v20 = vmax.f32 %v84_v19, 0.0 }
  0xad   :  { %103 = vmatmul.f32.vlgmr.msra.gmra.mxu1 %v86_v20 }
 0x12a   :  { %v104_v21 = vpop.f32.mrf.mxu1 }
 0x12b   :  { %v105_v22 = vadd.f32 %v131_v17, %v104_v21 }
 0x12d   :  { %107 = vst [vmem:[#allocation7] sm:$0xff] %v105_v22 }
 0x12e   :  { %118 = dma.vmem_to_hbm [thread:$0]  %s114_s25, 128, %s116_s28, [#allocation4]  }
 0x12f   :  { %208 = dma.done.wait [#allocation4], 128  }
 0x130   :  { %209 = vsyncadd [#allocation4], 4294967168 }
 0x131   :  { %123 = vsyncpa [#allocation3], 1 }
 0x132   :  { %124 = vsyncpa [#allocation6], 1 }
 0x133   :  { %125 = vsyncpa [#allocation4], 1 }

</bundles_post_ra>
